<compile_context>
chip_gen: v6e
topology: v6e:2x2x1
jax: 0.10.0
libtpu: 0.0.40
codegen_flags: <defaults>
</compile_context>

<pallas_src>
import jax
import jax.numpy as jnp
import numpy as np
from jax.experimental import pallas as pl
from jax.experimental.pallas import tpu as pltpu

LN_EPS = 1e-5  # PyTorch nn.LayerNorm default
LANE = 128
SUBLANE = 8


def _round_up(x, m):
    return ((x + m - 1) // m) * m


def _pick_batch_tiling(B):
    """Pick a batch tile (multiple of 8) and padded batch; keep >=2 grid steps when possible."""
    if B >= 512:
        tm = 256
    elif B >= 16:
        tm = _round_up(B, 16) // 2  # two grid steps, tm is a multiple of 8
    else:
        tm = 8
    B_pad = _round_up(B, tm)
    return tm, B_pad


# ---------------------------------------------------------------------------
# Fused kernel: [Linear -> LayerNorm -> ReLU]* -> Linear, one batch tile per step.
# ---------------------------------------------------------------------------
def _make_fused_ffn_kernel(num_hidden, hidden_logical_dims):
    def kernel(*refs):
        x_ref = refs[0]
        o_ref = refs[-1]
        p = refs[1:-1]

        h = x_ref[...]
        idx = 0
        for li in range(num_hidden):
            w_ref, b_ref, g_ref, bt_ref = p[idx:idx + 4]
            idx += 4
            d_log = hidden_logical_dims[li]

            # MXU matmul, f32 accumulation.
            y = jnp.dot(h, w_ref[...], preferred_element_type=jnp.float32) + b_ref[...]
            d_pad = y.shape[-1]

            # LayerNorm over the logical (unpadded) feature count only.
            if d_log == d_pad:
                mean = jnp.mean(y, axis=-1, keepdims=True)
                cent = y - mean
                var = jnp.mean(cent * cent, axis=-1, keepdims=True)
            else:
                inv_n = 1.0 / d_log
                mask = jax.lax.broadcasted_iota(jnp.int32, (1, d_pad), 1) < d_log
                # Padded lanes of y are exactly 0 (zero-padded W cols / bias).
                mean = jnp.sum(y, axis=-1, keepdims=True) * inv_n
                cent = jnp.where(mask, y - mean, 0.0)
                var = jnp.sum(cent * cent, axis=-1, keepdims=True) * inv_n

            yn = cent * jax.lax.rsqrt(var + LN_EPS)
            # gamma/beta are zero-padded -> padded lanes stay 0 through ReLU.
            h = jnp.maximum(yn * g_ref[...] + bt_ref[...], 0.0)
            # TODO(synk): training-mode dropout not implemented (eval: identity).

        w_ref, b_ref = p[idx:idx + 2]
        y = jnp.dot(h, w_ref[...], preferred_element_type=jnp.float32) + b_ref[...]
        o_ref[...] = y.astype(o_ref.dtype)

    return kernel


# ---------------------------------------------------------------------------
# Wrapper: pad to lane/sublane-friendly shapes, single pallas_call, slice back.
# ---------------------------------------------------------------------------
def ffn_forward(params, x):
    B, d_in = x.shape
    hidden = [p for kind, p in params if kind == "hidden"]
    (w_out, b_out), = [p for kind, p in params if kind == "out"]
    num_hidden = len(hidden)
    hidden_logical = [w.shape[1] for (w, _, _, _) in hidden]
    d_out = w_out.shape[1]

    # Pad feature dims to lane multiples, batch to the tile size.
    d_in_p = _round_up(d_in, LANE)
    hid_p = [_round_up(d, LANE) for d in hidden_logical]
    d_out_p = _round_up(d_out, LANE)
    tm, B_p = _pick_batch_tiling(B)

    def pad2(a, r, c):
        return jnp.pad(a, ((0, r - a.shape[0]), (0, c - a.shape[1])))

    x_p = pad2(x, B_p, d_in_p)

    flat_params = []
    flops = 0
    prev_p, prev_l = d_in_p, d_in
    for (w, b, g, bt), d_l, d_p in zip(hidden, hidden_logical, hid_p):
        flat_params += [pad2(w, prev_p, d_p), pad2(b, 1, d_p),
                        pad2(g, 1, d_p), pad2(bt, 1, d_p)]
        flops += 2 * B * prev_l * d_l
        prev_p, prev_l = d_p, d_l
    flat_params += [pad2(w_out, prev_p, d_out_p), pad2(b_out, 1, d_out_p)]
    flops += 2 * B * prev_l * d_out

    # BlockSpecs: activations tiled over batch; params full-block, constant index_map
    # (Pallas keeps them resident in VMEM across grid steps).
    in_specs = [pl.BlockSpec((tm, d_in_p), lambda i: (i, 0))]
    for a in flat_params:
        in_specs.append(pl.BlockSpec(a.shape, lambda i: (0, 0)))
    out_specs = pl.BlockSpec((tm, d_out_p), lambda i: (i, 0))

    param_bytes = sum(int(a.size) * 4 for a in flat_params)
    io_bytes = int(x_p.size) * 4 + param_bytes + B_p * d_out_p * 4
    # Double-buffered activation tiles + resident (possibly double-buffered) params + margin.
    vmem_need = 2 * 4 * tm * (d_in_p + d_out_p) + 2 * param_bytes + (2 << 20)
    vmem_limit = int(min(64 << 20, max(8 << 20, vmem_need)))

    kernel = _make_fused_ffn_kernel(num_hidden, tuple(hidden_logical))

    out_p = pl.pallas_call(
        kernel,
        out_shape=jax.ShapeDtypeStruct((B_p, d_out_p), x.dtype),
        grid_spec=pl.GridSpec(
            grid=(B_p // tm,),
            in_specs=in_specs,
            out_specs=out_specs,
        ),
        compiler_params=pltpu.CompilerParams(
            dimension_semantics=("parallel",),
            vmem_limit_bytes=vmem_limit,
        ),
        cost_estimate=pl.CostEstimate(
            flops=flops,
            transcendentals=B * num_hidden,  # one rsqrt per row per LN
            bytes_accessed=io_bytes,
        ),
    )(x_p, *flat_params)

    return out_p[:B, :d_out]


# ---------------------------------------------------------------------------
# Parameter init (deterministic, mimics PyTorch Linear default U(-1/sqrt(fan_in), ..))
# ---------------------------------------------------------------------------
def init_ffn_params(key, input_dim, hidden_dims, output_dim):
    dims = [input_dim] + list(hidden_dims) + [output_dim]
    params = []
    for li in range(len(dims) - 1):
        d_in, d_out = dims[li], dims[li + 1]
        key, kw, kb = jax.random.split(key, 3)
        bound = 1.0 / np.sqrt(d_in)
        w = jax.random.uniform(kw, (d_in, d_out), jnp.float32, -bound, bound)
        b = jax.random.uniform(kb, (1, d_out), jnp.float32, -bound, bound)
        if li < len(hidden_dims):
            g = jnp.ones((1, d_out), jnp.float32)
            beta = jnp.zeros((1, d_out), jnp.float32)
            params.append(("hidden", (w, b, g, beta)))
        else:
            params.append(("out", (w, b)))
    return params


def ffn_reference(params, x):
    """Pure-JAX reference for correctness checking."""
    h = x
    for kind, p in params:
        if kind == "hidden":
            w, b, g, beta = p
            y = h @ w + b
            mean = jnp.mean(y, axis=-1, keepdims=True)
            var = jnp.mean((y - mean) ** 2, axis=-1, keepdims=True)
            yn = (y - mean) * jax.lax.rsqrt(var + LN_EPS)
            h = jnp.maximum(yn * g + beta, 0.0)
        else:
            w, b = p
            h = h @ w + b
    return h


# ---------------------------------------------------------------------------
if __name__ == "__main__":
    key = jax.random.PRNGKey(0)
    kx, kp = jax.random.split(key)

    batch = 16
    input_dim = 32
    hidden_dims = [128, 64]
    output_dim = 16

    x = jax.random.normal(kx, (batch, input_dim), jnp.float32)
    params = init_ffn_params(kp, input_dim, hidden_dims, output_dim)

    out = ffn_forward(params, x)
    out = jax.block_until_ready(out)

    ref = ffn_reference(params, x)
    np.testing.assert_allclose(np.asarray(out), np.asarray(ref), rtol=1e-5, atol=1e-5)

    print("KERNEL_OK")
</pallas_src>

<mosaic_0001>
module attributes {stable_mosaic.version = 11 : i64} {
  func.func @kernel(%arg0: i32, %arg1: memref<8x128xf32, #tpu.memory_space<vmem>>, %arg2: memref<128x128xf32, #tpu.memory_space<vmem>>, %arg3: memref<1x128xf32, #tpu.memory_space<vmem>>, %arg4: memref<1x128xf32, #tpu.memory_space<vmem>>, %arg5: memref<1x128xf32, #tpu.memory_space<vmem>>, %arg6: memref<128x128xf32, #tpu.memory_space<vmem>>, %arg7: memref<1x128xf32, #tpu.memory_space<vmem>>, %arg8: memref<1x128xf32, #tpu.memory_space<vmem>>, %arg9: memref<1x128xf32, #tpu.memory_space<vmem>>, %arg10: memref<128x128xf32, #tpu.memory_space<vmem>>, %arg11: memref<1x128xf32, #tpu.memory_space<vmem>>, %arg12: memref<8x128xf32, #tpu.memory_space<vmem>>) attributes {dimension_semantics = [#tpu.dimension_semantics<parallel>], iteration_bounds = array<i64: 2>, scalar_prefetch = 0 : i64, scratch_operands = 0 : i64, tpu.core_type = #tpu.core_type<tc>, window_params = [{transform_indices = @transform_0, window_bounds = array<i64: 8, 128>}, {pipeline_mode = #tpu.pipeline_mode<synchronous>, transform_indices = @transform_1, window_bounds = array<i64: 128, 128>}, {pipeline_mode = #tpu.pipeline_mode<synchronous>, transform_indices = @transform_2, window_bounds = array<i64: 1, 128>}, {pipeline_mode = #tpu.pipeline_mode<synchronous>, transform_indices = @transform_3, window_bounds = array<i64: 1, 128>}, {pipeline_mode = #tpu.pipeline_mode<synchronous>, transform_indices = @transform_4, window_bounds = array<i64: 1, 128>}, {pipeline_mode = #tpu.pipeline_mode<synchronous>, transform_indices = @transform_5, window_bounds = array<i64: 128, 128>}, {pipeline_mode = #tpu.pipeline_mode<synchronous>, transform_indices = @transform_6, window_bounds = array<i64: 1, 128>}, {pipeline_mode = #tpu.pipeline_mode<synchronous>, transform_indices = @transform_7, window_bounds = array<i64: 1, 128>}, {pipeline_mode = #tpu.pipeline_mode<synchronous>, transform_indices = @transform_8, window_bounds = array<i64: 1, 128>}, {pipeline_mode = #tpu.pipeline_mode<synchronous>, transform_indices = @transform_9, window_bounds = array<i64: 128, 128>}, {pipeline_mode = #tpu.pipeline_mode<synchronous>, transform_indices = @transform_10, window_bounds = array<i64: 1, 128>}, {transform_indices = @transform_11, window_bounds = array<i64: 8, 128>}]} {
    %c0 = arith.constant 0 : index
    %c0_0 = arith.constant 0 : index
    %0 = vector.load %arg1[%c0, %c0_0] : memref<8x128xf32, #tpu.memory_space<vmem>>, vector<8x128xf32>
    %c0_1 = arith.constant 0 : index
    %c0_2 = arith.constant 0 : index
    %1 = vector.load %arg2[%c0_1, %c0_2] : memref<128x128xf32, #tpu.memory_space<vmem>>, vector<128x128xf32>
    %cst = arith.constant dense<0.000000e+00> : vector<8x128xf32>
    %2 = tpu.matmul %0, %1, %cst {dimension_numbers = #tpu.dot_dimension_numbers<[1], [0], [0], [1], [0, 0, 1, 1], [], []>} : vector<8x128xf32>, vector<128x128xf32>, vector<8x128xf32> -> vector<8x128xf32>
    %c0_3 = arith.constant 0 : index
    %c0_4 = arith.constant 0 : index
    %3 = vector.load %arg3[%c0_3, %c0_4] : memref<1x128xf32, #tpu.memory_space<vmem>>, vector<1x128xf32>
    %4 = vector.broadcast %3 : vector<1x128xf32> to vector<8x128xf32>
    %5 = arith.addf %2, %4 : vector<8x128xf32>
    %cst_5 = arith.constant dense<0.000000e+00> : vector<8xf32>
    %6 = vector.multi_reduction <add>, %5, %cst_5 [1] : vector<8x128xf32> to vector<8xf32>
    %7 = vector.shape_cast %6 : vector<8xf32> to vector<8x1xf32>
    %cst_6 = arith.constant 1.280000e+02 : f32
    %8 = vector.broadcast %cst_6 : f32 to vector<8x1xf32>
    %9 = arith.divf %7, %8 : vector<8x1xf32>
    %10 = vector.broadcast %9 : vector<8x1xf32> to vector<8x128xf32>
    %11 = arith.subf %5, %10 : vector<8x128xf32>
    %12 = arith.mulf %11, %11 : vector<8x128xf32>
    %cst_7 = arith.constant dense<0.000000e+00> : vector<8xf32>
    %13 = vector.multi_reduction <add>, %12, %cst_7 [1] : vector<8x128xf32> to vector<8xf32>
    %14 = vector.shape_cast %13 : vector<8xf32> to vector<8x1xf32>
    %cst_8 = arith.constant 1.280000e+02 : f32
    %15 = vector.broadcast %cst_8 : f32 to vector<8x1xf32>
    %16 = arith.divf %14, %15 : vector<8x1xf32>
    %cst_9 = arith.constant 9.99999974E-6 : f32
    %17 = vector.broadcast %cst_9 : f32 to vector<8x1xf32>
    %18 = arith.addf %16, %17 : vector<8x1xf32>
    %19 = math.rsqrt %18 : vector<8x1xf32>
    %20 = vector.broadcast %19 : vector<8x1xf32> to vector<8x128xf32>
    %21 = arith.mulf %11, %20 : vector<8x128xf32>
    %c0_10 = arith.constant 0 : index
    %c0_11 = arith.constant 0 : index
    %22 = vector.load %arg4[%c0_10, %c0_11] : memref<1x128xf32, #tpu.memory_space<vmem>>, vector<1x128xf32>
    %23 = vector.broadcast %22 : vector<1x128xf32> to vector<8x128xf32>
    %24 = arith.mulf %21, %23 : vector<8x128xf32>
    %c0_12 = arith.constant 0 : index
    %c0_13 = arith.constant 0 : index
    %25 = vector.load %arg5[%c0_12, %c0_13] : memref<1x128xf32, #tpu.memory_space<vmem>>, vector<1x128xf32>
    %26 = vector.broadcast %25 : vector<1x128xf32> to vector<8x128xf32>
    %27 = arith.addf %24, %26 : vector<8x128xf32>
    %cst_14 = arith.constant 0.000000e+00 : f32
    %28 = vector.broadcast %cst_14 : f32 to vector<8x128xf32>
    %29 = arith.maximumf %27, %28 : vector<8x128xf32>
    %c0_15 = arith.constant 0 : index
    %c0_16 = arith.constant 0 : index
    %30 = vector.load %arg6[%c0_15, %c0_16] : memref<128x128xf32, #tpu.memory_space<vmem>>, vector<128x128xf32>
    %cst_17 = arith.constant dense<0.000000e+00> : vector<8x128xf32>
    %31 = tpu.matmul %29, %30, %cst_17 {dimension_numbers = #tpu.dot_dimension_numbers<[1], [0], [0], [1], [0, 0, 1, 1], [], []>} : vector<8x128xf32>, vector<128x128xf32>, vector<8x128xf32> -> vector<8x128xf32>
    %c0_18 = arith.constant 0 : index
    %c0_19 = arith.constant 0 : index
    %32 = vector.load %arg7[%c0_18, %c0_19] : memref<1x128xf32, #tpu.memory_space<vmem>>, vector<1x128xf32>
    %33 = vector.broadcast %32 : vector<1x128xf32> to vector<8x128xf32>
    %34 = arith.addf %31, %33 : vector<8x128xf32>
    %35 = tpu.iota {dimensions = array<i32: 1>} : vector<1x128xi32>
    %c64_i32 = arith.constant 64 : i32
    %36 = vector.broadcast %c64_i32 : i32 to vector<1x128xi32>
    %37 = arith.cmpi slt, %35, %36 : vector<1x128xi32>
    %cst_20 = arith.constant dense<0.000000e+00> : vector<8xf32>
    %38 = vector.multi_reduction <add>, %34, %cst_20 [1] : vector<8x128xf32> to vector<8xf32>
    %39 = vector.shape_cast %38 : vector<8xf32> to vector<8x1xf32>
    %cst_21 = arith.constant 1.562500e-02 : f32
    %40 = vector.broadcast %cst_21 : f32 to vector<8x1xf32>
    %41 = arith.mulf %39, %40 : vector<8x1xf32>
    %42 = vector.broadcast %41 : vector<8x1xf32> to vector<8x128xf32>
    %43 = arith.subf %34, %42 : vector<8x128xf32>
    %cst_22 = arith.constant 0.000000e+00 : f32
    %44 = vector.shape_cast %37 : vector<1x128xi1> to vector<1x128xi1>
    %45 = vector.broadcast %44 : vector<1x128xi1> to vector<8x128xi1>
    %46 = vector.broadcast %cst_22 : f32 to vector<8x128xf32>
    %47 = arith.select %45, %43, %46 : vector<8x128xi1>, vector<8x128xf32>
    %48 = arith.mulf %47, %47 : vector<8x128xf32>
    %cst_23 = arith.constant dense<0.000000e+00> : vector<8xf32>
    %49 = vector.multi_reduction <add>, %48, %cst_23 [1] : vector<8x128xf32> to vector<8xf32>
    %50 = vector.shape_cast %49 : vector<8xf32> to vector<8x1xf32>
    %cst_24 = arith.constant 1.562500e-02 : f32
    %51 = vector.broadcast %cst_24 : f32 to vector<8x1xf32>
    %52 = arith.mulf %50, %51 : vector<8x1xf32>
    %cst_25 = arith.constant 9.99999974E-6 : f32
    %53 = vector.broadcast %cst_25 : f32 to vector<8x1xf32>
    %54 = arith.addf %52, %53 : vector<8x1xf32>
    %55 = math.rsqrt %54 : vector<8x1xf32>
    %56 = vector.broadcast %55 : vector<8x1xf32> to vector<8x128xf32>
    %57 = arith.mulf %47, %56 : vector<8x128xf32>
    %c0_26 = arith.constant 0 : index
    %c0_27 = arith.constant 0 : index
    %58 = vector.load %arg8[%c0_26, %c0_27] : memref<1x128xf32, #tpu.memory_space<vmem>>, vector<1x128xf32>
    %59 = vector.broadcast %58 : vector<1x128xf32> to vector<8x128xf32>
    %60 = arith.mulf %57, %59 : vector<8x128xf32>
    %c0_28 = arith.constant 0 : index
    %c0_29 = arith.constant 0 : index
    %61 = vector.load %arg9[%c0_28, %c0_29] : memref<1x128xf32, #tpu.memory_space<vmem>>, vector<1x128xf32>
    %62 = vector.broadcast %61 : vector<1x128xf32> to vector<8x128xf32>
    %63 = arith.addf %60, %62 : vector<8x128xf32>
    %cst_30 = arith.constant 0.000000e+00 : f32
    %64 = vector.broadcast %cst_30 : f32 to vector<8x128xf32>
    %65 = arith.maximumf %63, %64 : vector<8x128xf32>
    %c0_31 = arith.constant 0 : index
    %c0_32 = arith.constant 0 : index
    %66 = vector.load %arg10[%c0_31, %c0_32] : memref<128x128xf32, #tpu.memory_space<vmem>>, vector<128x128xf32>
    %cst_33 = arith.constant dense<0.000000e+00> : vector<8x128xf32>
    %67 = tpu.matmul %65, %66, %cst_33 {dimension_numbers = #tpu.dot_dimension_numbers<[1], [0], [0], [1], [0, 0, 1, 1], [], []>} : vector<8x128xf32>, vector<128x128xf32>, vector<8x128xf32> -> vector<8x128xf32>
    %c0_34 = arith.constant 0 : index
    %c0_35 = arith.constant 0 : index
    %68 = vector.load %arg11[%c0_34, %c0_35] : memref<1x128xf32, #tpu.memory_space<vmem>>, vector<1x128xf32>
    %69 = vector.broadcast %68 : vector<1x128xf32> to vector<8x128xf32>
    %70 = arith.addf %67, %69 : vector<8x128xf32>
    %c0_36 = arith.constant 0 : index
    %c0_37 = arith.constant 0 : index
    %71 = vector.load %arg12[%c0_36, %c0_37] : memref<8x128xf32, #tpu.memory_space<vmem>>, vector<8x128xf32>
    tpu.vector_store %arg12[%c0_36, %c0_37], %70 {strides = array<i32>} : memref<8x128xf32, #tpu.memory_space<vmem>>, vector<8x128xf32>,
    return
  }
  func.func @transform_0(%arg0: i32) -> (i32, i32) {
    %c0_i32 = arith.constant 0 : i32
    %c0_i32_0 = arith.constant 0 : i32
    return %arg0, %c0_i32 : i32, i32
  }
  func.func @transform_1(%arg0: i32) -> (i32, i32) {
    %c0_i32 = arith.constant 0 : i32
    %c0_i32_0 = arith.constant 0 : i32
    %c0_i32_1 = arith.constant 0 : i32
    return %c0_i32, %c0_i32_0 : i32, i32
  }
  func.func @transform_2(%arg0: i32) -> (i32, i32) {
    %c0_i32 = arith.constant 0 : i32
    %c0_i32_0 = arith.constant 0 : i32
    %c0_i32_1 = arith.constant 0 : i32
    return %c0_i32, %c0_i32_0 : i32, i32
  }
  func.func @transform_3(%arg0: i32) -> (i32, i32) {
    %c0_i32 = arith.constant 0 : i32
    %c0_i32_0 = arith.constant 0 : i32
    %c0_i32_1 = arith.constant 0 : i32
    return %c0_i32, %c0_i32_0 : i32, i32
  }
  func.func @transform_4(%arg0: i32) -> (i32, i32) {
    %c0_i32 = arith.constant 0 : i32
    %c0_i32_0 = arith.constant 0 : i32
    %c0_i32_1 = arith.constant 0 : i32
    return %c0_i32, %c0_i32_0 : i32, i32
  }
  func.func @transform_5(%arg0: i32) -> (i32, i32) {
    %c0_i32 = arith.constant 0 : i32
    %c0_i32_0 = arith.constant 0 : i32
    %c0_i32_1 = arith.constant 0 : i32
    return %c0_i32, %c0_i32_0 : i32, i32
  }
  func.func @transform_6(%arg0: i32) -> (i32, i32) {
    %c0_i32 = arith.constant 0 : i32
    %c0_i32_0 = arith.constant 0 : i32
    %c0_i32_1 = arith.constant 0 : i32
    return %c0_i32, %c0_i32_0 : i32, i32
  }
  func.func @transform_7(%arg0: i32) -> (i32, i32) {
    %c0_i32 = arith.constant 0 : i32
    %c0_i32_0 = arith.constant 0 : i32
    %c0_i32_1 = arith.constant 0 : i32
    return %c0_i32, %c0_i32_0 : i32, i32
  }
  func.func @transform_8(%arg0: i32) -> (i32, i32) {
    %c0_i32 = arith.constant 0 : i32
    %c0_i32_0 = arith.constant 0 : i32
    %c0_i32_1 = arith.constant 0 : i32
    return %c0_i32, %c0_i32_0 : i32, i32
  }
  func.func @transform_9(%arg0: i32) -> (i32, i32) {
    %c0_i32 = arith.constant 0 : i32
    %c0_i32_0 = arith.constant 0 : i32
    %c0_i32_1 = arith.constant 0 : i32
    return %c0_i32, %c0_i32_0 : i32, i32
  }
  func.func @transform_10(%arg0: i32) -> (i32, i32) {
    %c0_i32 = arith.constant 0 : i32
    %c0_i32_0 = arith.constant 0 : i32
    %c0_i32_1 = arith.constant 0 : i32
    return %c0_i32, %c0_i32_0 : i32, i32
  }
  func.func @transform_11(%arg0: i32) -> (i32, i32) {
    %c0_i32 = arith.constant 0 : i32
    %c0_i32_0 = arith.constant 0 : i32
    return %arg0, %c0_i32 : i32, i32
  }
}

</mosaic_0001>

<bundles_post_ra>
// kernel: tpu_custom_call.1
= control target key start
LH: loop header
LB: loop body
LE: loop exit
PB: predicated region body
PF: predicated region fallthrough
CT: control target
= control target key end

     0   :  { %s1683_s0 = inlined_call_operand.hbm [shape: f32[16,128], index: 0, kind: input, shape index: {}]   ;;  %s1684_s1 = inlined_call_operand.hbm [shape: f32[128,128], index: 1, kind: input, shape index: {}]   ;;  %s1685_s2 = inlined_call_operand.vmem [shape: f32[1,128], index: 2, kind: input, shape index: {}]   ;;  %s1686_s3 = inlined_call_operand.vmem [shape: f32[1,128], index: 3, kind: input, shape index: {}]   ;;  %s1687_s4 = inlined_call_operand.vmem [shape: f32[1,128], index: 4, kind: input, shape index: {}]   ;;  %s1688_s5 = inlined_call_operand.hbm [shape: f32[128,128], index: 5, kind: input, shape index: {}]   ;;  %s1689_s6 = inlined_call_operand.vmem [shape: f32[1,128], index: 6, kind: input, shape index: {}]   ;;  %s1690_s7 = inlined_call_operand.vmem [shape: f32[1,128], index: 7, kind: input, shape index: {}]   ;;  %s1691_s8 = inlined_call_operand.vmem [shape: f32[1,128], index: 8, kind: input, shape index: {}]   ;;  %s1692_s9 = inlined_call_operand.hbm [shape: f32[128,128], index: 9, kind: input, shape index: {}]   ;;  %s1693_s10 = inlined_call_operand.vmem [shape: f32[1,128], index: 10, kind: input, shape index: {}]   ;;  %s1694_s11 = inlined_call_operand.hbm [shape: f32[16,128], index: 11, kind: output, shape index: {}]  }
   0x1   :  { %1702 = sst [smem:[#allocation18_spill]] %s1684_s1 }
   0x2   :  { %1703 = sst [smem:[#allocation19_spill]] %s1688_s5 }
   0x3   :  { %1704 = sst [smem:[#allocation20_spill]] %s1692_s9 }
   0x4   :  { %16 = vsyncpa [#allocation3], 0 }
   0x5   :  { %18 = vsyncpa [#allocation3 + $0x1], 0 }
   0x6   :  { %19 = vsyncpa [#allocation6], 0 }
   0x7   :  { %20 = vsyncpa [#allocation9], 0 }
   0x8   :  { %21 = vsyncpa [#allocation4], 0 }
   0x9   :  { %23 = vsyncpa [#allocation4 + $0x1], 0  ;;  %s1418_s17 = smov 0   ;;  %s1420_s18 = smov 0  }
   0xa   :  { %s1422_s19 = smov 0   ;;  %s1424_s20 = smov 0  }
   0xb LB: > { %1705 = sst [smem:[#allocation15_spill]] %s1343_s19  ;;  %s1439_s21 = sadd.s32 4294967295, %s1347_s20   ;;  %s1347_s20 = sphi %s1424_s20, %s1727_s20   ;;  %s1343_s19 = sphi %s1422_s19, %s1729_s19   ;;  %s1339_s18 = sphi %s1420_s18, %s1731_s18   ;;  %s1335_s17 = sphi %s1418_s17, %s1730_s17  }
   0xc   : > { %s903_s22 = sadd.s32 4294967294, %s1347_s20   ;;  %p49_p0 = scmp.ne.s32.totalorder %s1339_s18, %s1335_s17 }
   0xd   : > { %p1695_p1 = scmp.eq.s32.totalorder %s1439_s21, 0  ;;  %p289_p3 = scmp.eq.s32.totalorder %s903_s22, 1 }
   0xe   : > { %p904_p5 = scmp.ge.s32.totalorder %s1347_s20, 1  ;;  %p296_p7 = scmp.lt.s32.totalorder %s1347_s20, 3 }
   0xf   : > { %p1448_p4 = por %p1695_p1, %p49_p0  ;;  %p1453_p6 = por %p289_p3, %p49_p0 }
  0x10   : > { %p1458_p8 = pnand %p904_p5, %p296_p7  ;;  %s1349_s26 = smov [#allocation5]  }
  0x11   : > { %s1706_s23 = scalar_select %p1448_p4, 1, 0 }
  0x12   : > { %s1707_s24 = scalar_select %p1453_p6, 1, 0 }
  0x13   : > { %s1708_s25 = scalar_select %p1458_p8, 1, 0 }
  0x14   : > { %s308_s27 = sshll.u32 %s1349_s26, 4  ;;  %p1100_p9 = pneg %p1458_p8  ;;  %s309_s27 = int_to_ptr.vmem [resolvable:$true] %s308_s27 }
  0x15   : > { %s1350_s29 = smov [#allocation7]   ;;  %s1351_s12 = smov [#allocation8]  }
  0x16   : > { %p1467_p11 = pnand %p1100_p9, %p1695_p1  ;;  %s330_s30 = sshll.u32 %s1350_s29, 4  ;;  %s331_s30 = int_to_ptr.vmem [resolvable:$true] %s330_s30 }
  0x17   : > { %s352_s13 = sshll.u32 %s1351_s12, 4  ;;  %s1180_s14 = scalar_lea.vmem %s309_s27, 2048  ;;  %s353_s13 = int_to_ptr.vmem [resolvable:$true] %s352_s13 }
  0x18   : > { %p1171_p12 = pneg %p1467_p11  ;;  %p1181_p13 = scmp.ne.s32.totalorder %s309_s27, %s1180_s14 }
  0x19   : > { %p1188_p5 = scmp.lt.s32.totalorder %s309_s27, %s309_s27  ;;  %p1189_p7 = scmp.lt.s32.totalorder %s1180_s14, %s1180_s14 }
  0x1a   : > { %p1183_p0 = pnand %p1181_p13, %p1171_p12 }
  0x1b   : > { %p1190_p9 = por %p1189_p7, %p1188_p5 }
  0x1c   : > { %p1184_p3 = pneg %p1183_p0 }
  0x1e   : > { %p1191_p10 = pnand %p1190_p9, %p1184_p3 }
  0x20   : > { %1194 = shalt.err (!%p1191_p10)
}
  0x21   : > { %s1352_s15 = smov 128   ;;  %s1353_s16 = smov 8  }
  0x22   : > { %s1710_s1 = sld [smem:[#allocation18_spill]]  ;;  %s1206_s29 = scalar_lea.vmem %s331_s30, 2048 }
  0x23   : > { %p1207_p1 = scmp.ne.s32.totalorder %s331_s30, %s1206_s29  ;;  %p1214_p2 = scmp.lt.s32.totalorder %s331_s30, %s331_s30 }
  0x24   : > { %p1215_p6 = scmp.lt.s32.totalorder %s1206_s29, %s1206_s29 }
  0x25   : > { %p1209_p13 = pnand %p1207_p1, %p1171_p12 }
  0x26   : > { %p1216_p5 = por %p1215_p6, %p1214_p2 }
  0x27   : > { %p1210_p0 = pneg %p1209_p13 }
  0x28   : > { %1103 = dma.hbm_to_vmem [thread:$0]  (!%p1467_p11), %s1710_s1, 2048, %s309_s27, [#allocation6], %s1352_s15, %s1352_s15, %s1353_s16  }
  0x29   : > { %p1217_p3 = pnand %p1216_p5, %p1210_p0 }
  0x2b   : > { %1220 = shalt.err (!%p1217_p3)
}
  0x2c   : > { %s1711_s5 = sld [smem:[#allocation19_spill]]  ;;  %s1232_s27 = scalar_lea.vmem %s353_s13, 2048 }
  0x2d   : > { %p1233_p10 = scmp.ne.s32.totalorder %s353_s13, %s1232_s27  ;;  %p1240_p9 = scmp.lt.s32.totalorder %s353_s13, %s353_s13 }
  0x2e   : > { %p1241_p13 = scmp.lt.s32.totalorder %s1232_s27, %s1232_s27 }
  0x2f   : > { %p1235_p7 = pnand %p1233_p10, %p1171_p12 }
  0x30   : > { %p1242_p4 = por %p1241_p13, %p1240_p9 }
  0x31   : > { %p1236_p1 = pneg %p1235_p7 }
  0x32   : > { %1106 = dma.hbm_to_vmem [thread:$0]  (!%p1467_p11), %s1711_s5, 2048, %s331_s30, [#allocation6], %s1352_s15, %s1352_s15, %s1353_s16  }
  0x33   : > { %p1243_p2 = pnand %p1242_p4, %p1236_p1 }
  0x35   : > { %1246 = shalt.err (!%p1243_p2)
}
  0x36   : > { %s1712_s9 = sld [smem:[#allocation20_spill]]  ;;  %s1498_s30 = sadd.s32 1, %s1347_s20  }
  0x37   : > { %1713 = sst [smem:[#allocation16_spill]] %s1498_s30  ;;  %s33_s29 = ssub.s32 %s1347_s20, %s1498_s30 }
  0x38   : > { %s36_s28 = sadd.s32 1, %s1343_s19  ;;  %p34_p4 = scmp.eq.s32.totalorder %s33_s29, 0 }
  0x39   : > { %p43_p6 = scmp.ne.s32.totalorder %s1343_s19, %s1339_s18  ;;  %p44_p12 = scmp.eq.s32.totalorder %s1347_s20, 0 }
  0x3a   : > { %p1121_p0 = scmp.lt.s32.totalorder %s1347_s20, 2  ;;  %p1715_p3 = scmp.eq.s32.totalorder %s1439_s21, 1 }
  0x3b   : > { %s1508_s12 = scalar_select %p34_p4, %s1343_s19, %s36_s28  }
  0x3c   : > { %1109 = dma.hbm_to_vmem [thread:$0]  (!%p1467_p11), %s1712_s9, 2048, %s353_s13, [#allocation9], %s1352_s15, %s1352_s15, %s1353_s16  }
  0x3d   : > { %1714 = sst [smem:[#allocation17_spill]] %s1508_s12  ;;  %p45_p5 = por %p44_p12, %p43_p6 }
  0x3e   : > { %p1512_p10 = por %p1715_p3, %p43_p6  ;;  %s369_s27 = sand.u32 1, %s1343_s19  }
  0x3f   : > { %s910_s22 = sshll.u32 %s1347_s20, 7  ;;  %s909_s13 = sshll.u32 %s369_s27, 3 }
  0x40   : > { %s1716_s14 = scalar_select %p1512_p10, 1, 0 }
  0x41   : > { %s1521_s26 = scalar_lea.hbm %s1683_s0, %s910_s22  ;;  %s373_s29 = scalar_lea.vmem [#allocation2], %s909_s13 }
  0x42   : > { %s380_s28 = sshll.u32 %s373_s29, 4  ;;  %p1523_p11 = pnand %p1121_p0, %p45_p5  ;;  %s381_s28 = int_to_ptr.vmem [resolvable:$true] %s380_s28 }
  0x43   : > { %s370_s5 = scalar_lea.sflag [#allocation3], %s369_s27  ;;  %s1247_s9 = scalar_lea.hbm %s1521_s26, 128 }
  0x44   : > { %p1248_p7 = scmp.ne.s32.totalorder %s1521_s26, %s1247_s9  ;;  %p1249_p1 = pneg %p1523_p11 }
  0x45   : > { %s1252_s16 = scalar_lea.hbm %s1683_s0, 256  ;;  %p1253_p2 = scmp.lt.s32.totalorder %s1521_s26, %s1683_s0 }
  0x46   : > { %p1250_p9 = pnand %p1249_p1, %p1248_p7  ;;  %p1254_p4 = scmp.lt.s32.totalorder %s1252_s16, %s1247_s9 }
  0x48   : > { %p1251_p13 = pneg %p1250_p9  ;;  %p1255_p6 = por %p1254_p4, %p1253_p2 }
  0x4a   : > { %p1256_p12 = pnand %p1255_p6, %p1251_p13 }
  0x4c   : > { %1259 = shalt.err (!%p1256_p12)
}
  0x4d   : > { %s1260_s29 = scalar_lea.vmem %s381_s28, 128  ;;  %s1354_s27 = smov [#allocation2]  }
  0x4e   : > { %p1261_p0 = scmp.ne.s32.totalorder %s381_s28, %s1260_s29  ;;  %s1265_s19 = sshll.u32 %s1354_s27, 4  ;;  %s1266_s19 = int_to_ptr.vmem [resolvable:$false] %s1265_s19 }
  0x4f   : > { %s1267_s30 = scalar_lea.vmem %s1266_s19, 256  ;;  %p1268_p7 = scmp.lt.s32.totalorder %s381_s28, %s1266_s19 }
  0x50   : > { %p1263_p5 = pnand %p1261_p0, %p1249_p1  ;;  %p1269_p9 = scmp.lt.s32.totalorder %s1267_s30, %s1260_s29 }
  0x52   : > { %p1264_p3 = pneg %p1263_p5  ;;  %p1270_p10 = por %p1269_p9, %p1268_p7 }
  0x54   : > { %p1271_p8 = pnand %p1270_p10, %p1264_p3 }
  0x56   : > { %1274 = shalt.err (!%p1271_p8)
}
  0x57   : > { %1113 = dma.hbm_to_vmem [thread:$0]  (!%p1523_p11), %s1521_s26, 128, %s381_s28, %s370_s5  }
  0x58   : > { %p1718_p13 = scmp.ne.s32.totalorder %s1708_s25, 0 }
  0x59   : > { %s1544_s9 = sand.u32 (!%p1718_p13), 1, %s1339_s18   ;;  %p1719_p8 = scmp.ne.s32.totalorder (!%p1718_p13), %s1706_s23, 0 }
  0x5a   : > { %389 = sbr.rel (%p1718_p13) target bundleno = 1351 (0x547), region = 64  ;;  %s912_s12 = sshll.u32 (!%p1718_p13), %s1544_s9, 3 }
  0x5b   : > { %s392_s19 = scalar_lea.sflag (!%p1718_p13), [#allocation3], %s1544_s9  ;;  %s1550_s30 = scalar_lea.vmem (!%p1718_p13), [#allocation2], %s912_s12 }
  0x5f   : > { %1318 = dma.done.wait (%p1719_p8), %s392_s19, 128  }
  0x60   : > { %1320 = vsyncadd (%p1719_p8), %s392_s19, 4294967168  ;;  %p1720_p10 = scmp.eq.s32.totalorder %s1439_s21, 0 }
  0x62   : > { %1322 = dma.done.wait (%p1720_p10), [#allocation6], 4096   ;;  %p1721_p11 = pmov %p1720_p10 }
  0x63   : > { %p1722_p1 = pmov %p1720_p10 }
  0x64   : > { %1324 = vsyncadd (%p1721_p11), [#allocation6], 4294963200 }
  0x65   : > { %1326 = dma.done.wait (%p1722_p1), [#allocation9], 2048   ;;  %p1723_p2 = pmov %p1722_p1 }
  0x66   : > { %v1355_v0 = vmov 0.0   ;;  %vm1356_vm0 = vmmov 0   ;;  %v462_v1 = vld [vmem:[#allocation5 + $0x78] sm:$0xff]  ;;  %v461_v2 = vld [vmem:[#allocation5 + $0x70] sm:$0xff]  ;;  %v460_v3 = vld [vmem:[#allocation5 + $0x68] sm:$0xff]  ;;  %v662_v59 = vlaneseq  ;;  %s925_s1 = sshll.u32 %s1439_s21, 7 }
  0x67   : > { %1328 = vsyncadd (%p1723_p2), [#allocation9], 4294965248  ;;  %979 = vmatprep.subr.mxu0 %v1355_v0  ;;  %1011 = vmatprep.mubr.msk.f32.mxu0 %vm1356_vm0, %v1355_v0  ;;  %v459_v4 = vld [vmem:[#allocation5 + $0x60] sm:$0xff]  ;;  %v458_v5 = vld [vmem:[#allocation5 + $0x58] sm:$0xff]  ;;  %s445_s5 = scalar_lea.vmem [#allocation10], %s912_s12  ;;  %s1646_s28 = scalar_lea.hbm %s1694_s11, %s925_s1 }
  0x68   : > { %1014 = vmatprep.subr.mxu1 %v1355_v0  ;;  %1046 = vmatprep.mubr.msk.f32.mxu1 %vm1356_vm0, %v1355_v0  ;;  %v457_v6 = vld [vmem:[#allocation5 + $0x50] sm:$0xff]  ;;  %v456_v7 = vld [vmem:[#allocation5 + $0x48] sm:$0xff]  ;;  %v455_v8 = vld [vmem:[#allocation5 + $0x40] sm:$0xff]  ;;  %v663_v60 = vand.u32 127, %v662_v59  ;;  %s804_s23 = sshll.u32 %s445_s5, 4  ;;  %s791_s22 = scalar_lea.sflag [#allocation4], %s1544_s9  ;;  %s805_s23 = int_to_ptr.vmem [resolvable:$true] %s804_s23 }
  0x69   : > { %980 = vmatpush3.msra.mxu0 %v462_v1  ;;  %v454_v9 = vld [vmem:[#allocation5 + $0x38] sm:$0xff]  ;;  %v453_v10 = vld [vmem:[#allocation5 + $0x30] sm:$0xff]  ;;  %v452_v11 = vld [vmem:[#allocation5 + $0x28] sm:$0xff]  ;;  %s1275_s15 = scalar_lea.vmem %s805_s23, 128  ;;  %p1724_p6 = scmp.ne.s32.totalorder %s1716_s14, 0 }
  0x6a   : > { %981 = vmatprep.subr.mxu0 %v1355_v0  ;;  %v451_v12 = vld [vmem:[#allocation5 + $0x20] sm:$0xff]  ;;  %v450_v13 = vld [vmem:[#allocation5 + $0x18] sm:$0xff]  ;;  %v449_v14 = vld [vmem:[#allocation5 + $0x10] sm:$0xff]  ;;  %vm664_vm1 = vcmp.lt.s32.totalorder %v663_v60, 64  ;;  %p1276_p4 = scmp.ne.s32.totalorder %s805_s23, %s1275_s15  ;;  %s1357_s21 = smov [#allocation10]  }
  0x6b   : > { %982 = vmatpush3.msra.mxu0 %v461_v2  ;;  %v448_v15 = vld [vmem:[#allocation5 + $0x8] sm:$0xff]  ;;  %v447_v16 = vld [vmem:[#allocation5] sm:$0xff]  ;;  %v446_v17 = vld [vmem:[%s1550_s30] sm:$0xff]  ;;  %s1279_s16 = sshll.u32 %s1357_s21, 4  ;;  %s1280_s16 = int_to_ptr.vmem [resolvable:$false] %s1279_s16 }
  0x6c   : > { %983 = vmatprep.subr.mxu0 %v1355_v0  ;;  %v917_v18 = vld [vmem:[%s1685_s2] ss:$0 sm:$0xff]  ;;  %v584_v22 = vld [vmem:[#allocation7 + $0x78] sm:$0xff]  ;;  %v582_v24 = vld [vmem:[#allocation7 + $0x68] sm:$0xff]  ;;  %p1277_p12 = pnand %p1276_p4, %p1724_p6  ;;  %s1281_s12 = scalar_lea.vmem %s1280_s16, 256 }
  0x6d   : > { %984 = vmatpush3.msra.mxu0 %v460_v3  ;;  %v583_v23 = vld [vmem:[#allocation7 + $0x70] sm:$0xff]  ;;  %1015 = vmatpush3.msra.mxu1 %v584_v22  ;;  %v581_v29 = vld [vmem:[#allocation7 + $0x60] sm:$0xff]  ;;  %v580_v30 = vld [vmem:[#allocation7 + $0x58] sm:$0xff]  ;;  %p1282_p5 = scmp.lt.s32.totalorder %s805_s23, %s1280_s16  ;;  %p1283_p3 = scmp.lt.s32.totalorder %s1281_s12, %s1275_s15 }
  0x6e   : > { %985 = vmatprep.subr.mxu0 %v1355_v0  ;;  %1016 = vmatprep.subr.mxu1 %v1355_v0  ;;  %v579_v31 = vld [vmem:[#allocation7 + $0x50] sm:$0xff]  ;;  %v578_v32 = vld [vmem:[#allocation7 + $0x48] sm:$0xff]  ;;  %v577_v33 = vld [vmem:[#allocation7 + $0x40] sm:$0xff]  ;;  %p1278_p0 = pneg %p1277_p12 }
  0x6f   : > { %986 = vmatpush3.msra.mxu0 %v459_v4  ;;  %1017 = vmatpush3.msra.mxu1 %v583_v23  ;;  %v576_v34 = vld [vmem:[#allocation7 + $0x38] sm:$0xff]  ;;  %v575_v35 = vld [vmem:[#allocation7 + $0x30] sm:$0xff]  ;;  %v574_v36 = vld [vmem:[#allocation7 + $0x28] sm:$0xff]  ;;  %p1284_p7 = por %p1283_p3, %p1282_p5 }
  0x70   : > { %987 = vmatprep.subr.mxu0 %v1355_v0  ;;  %1018 = vmatprep.subr.mxu1 %v1355_v0  ;;  %v573_v37 = vld [vmem:[#allocation7 + $0x20] sm:$0xff]  ;;  %v572_v38 = vld [vmem:[#allocation7 + $0x18] sm:$0xff]  ;;  %v571_v39 = vld [vmem:[#allocation7 + $0x10] sm:$0xff] }
  0x71   : > { %988 = vmatpush3.msra.mxu0 %v458_v5  ;;  %1019 = vmatpush3.msra.mxu1 %v582_v24  ;;  %v570_v40 = vld [vmem:[#allocation7 + $0x8] sm:$0xff]  ;;  %v569_v41 = vld [vmem:[#allocation7] sm:$0xff]  ;;  %v918_v46 = vld [vmem:[%s1686_s3] ss:$0 sm:$0xff]  ;;  %p1285_p9 = pnand %p1284_p7, %p1278_p0 }
  0x72   : > { %989 = vmatprep.subr.mxu0 %v1355_v0  ;;  %1020 = vmatprep.subr.mxu1 %v1355_v0  ;;  %v919_v48 = vld [vmem:[%s1687_s4] ss:$0 sm:$0xff]  ;;  %v711_v56 = vld [vmem:[#allocation8 + $0x78] sm:$0xff]  ;;  %v709_v58 = vld [vmem:[#allocation8 + $0x68] sm:$0xff] }
  0x73   : > { %990 = vmatpush3.msra.mxu0 %v457_v6  ;;  %1021 = vmatpush3.msra.mxu1 %v581_v29  ;;  %v920_v52 = vld [vmem:[%s1689_s6] ss:$0 sm:$0xff]  ;;  %v708_v3 = vld [vmem:[#allocation8 + $0x60] sm:$0xff]  ;;  %v707_v4 = vld [vmem:[#allocation8 + $0x58] sm:$0xff] }
  0x74   : > { %991 = vmatprep.subr.mxu0 %v1355_v0  ;;  %1022 = vmatprep.subr.mxu1 %v1355_v0  ;;  %v710_v57 = vld [vmem:[#allocation8 + $0x70] sm:$0xff]  ;;  %v705_v6 = vld [vmem:[#allocation8 + $0x48] sm:$0xff] }
  0x75   : > { %992 = vmatpush3.msra.mxu0 %v456_v7  ;;  %1023 = vmatpush3.msra.mxu1 %v580_v30  ;;  %v706_v5 = vld [vmem:[#allocation8 + $0x50] sm:$0xff]  ;;  %v704_v7 = vld [vmem:[#allocation8 + $0x40] sm:$0xff] }
  0x76   : > { %993 = vmatprep.subr.mxu0 %v1355_v0  ;;  %1024 = vmatprep.subr.mxu1 %v1355_v0  ;;  %v922_v22 = vld [vmem:[%s1691_s8] ss:$0 sm:$0xff] }
  0x77   : > { %994 = vmatpush3.msra.mxu0 %v455_v8  ;;  %1025 = vmatpush3.msra.mxu1 %v579_v31  ;;  %v703_v8 = vld [vmem:[#allocation8 + $0x38] sm:$0xff] }
  0x78   : > { %995 = vmatprep.subr.mxu0 %v1355_v0  ;;  %1026 = vmatprep.subr.mxu1 %v1355_v0 }
  0x79   : > { %996 = vmatpush3.msra.mxu0 %v454_v9  ;;  %1027 = vmatpush3.msra.mxu1 %v578_v32  ;;  %v702_v9 = vld [vmem:[#allocation8 + $0x30] sm:$0xff] }
  0x7a   : > { %997 = vmatprep.subr.mxu0 %v1355_v0  ;;  %1028 = vmatprep.subr.mxu1 %v1355_v0 }
  0x7b   : > { %998 = vmatpush3.msra.mxu0 %v453_v10  ;;  %1029 = vmatpush3.msra.mxu1 %v577_v33  ;;  %v701_v10 = vld [vmem:[#allocation8 + $0x28] sm:$0xff] }
  0x7c   : > { %999 = vmatprep.subr.mxu0 %v1355_v0  ;;  %1030 = vmatprep.subr.mxu1 %v1355_v0 }
  0x7d   : > { %1000 = vmatpush3.msra.mxu0 %v452_v11  ;;  %1031 = vmatpush3.msra.mxu1 %v576_v34  ;;  %v700_v11 = vld [vmem:[#allocation8 + $0x20] sm:$0xff] }
  0x7e   : > { %1001 = vmatprep.subr.mxu0 %v1355_v0  ;;  %1032 = vmatprep.subr.mxu1 %v1355_v0 }
  0x7f   : > { %1002 = vmatpush3.msra.mxu0 %v451_v12  ;;  %1033 = vmatpush3.msra.mxu1 %v575_v35  ;;  %v699_v12 = vld [vmem:[#allocation8 + $0x18] sm:$0xff] }
  0x80   : > { %1003 = vmatprep.subr.mxu0 %v1355_v0  ;;  %1034 = vmatprep.subr.mxu1 %v1355_v0 }
  0x81   : > { %1004 = vmatpush3.msra.mxu0 %v450_v13  ;;  %1035 = vmatpush3.msra.mxu1 %v574_v36  ;;  %v698_v13 = vld [vmem:[#allocation8 + $0x10] sm:$0xff] }
  0x82   : > { %1005 = vmatprep.subr.mxu0 %v1355_v0  ;;  %1036 = vmatprep.subr.mxu1 %v1355_v0 }
  0x83   : > { %1006 = vmatpush3.msra.mxu0 %v449_v14  ;;  %1037 = vmatpush3.msra.mxu1 %v573_v37  ;;  %v697_v14 = vld [vmem:[#allocation8 + $0x8] sm:$0xff] }
  0x84   : > { %1007 = vmatprep.subr.mxu0 %v1355_v0  ;;  %1038 = vmatprep.subr.mxu1 %v1355_v0 }
  0x85   : > { %1008 = vmatpush3.msra.mxu0 %v448_v15  ;;  %1039 = vmatpush3.msra.mxu1 %v572_v38  ;;  %v696_v15 = vld [vmem:[#allocation8] sm:$0xff] }
  0x86   : > { %1009 = vmatprep.subr.mxu0 %v1355_v0  ;;  %1040 = vmatprep.subr.mxu1 %v1355_v0 }
  0x87   : > { %1010 = vmatpush3.msra.mxu0 %v447_v16  ;;  %1041 = vmatpush3.msra.mxu1 %v571_v39 }
  0x88   : > { %1012 = vmatmul.mubr.f32.vlgmr.msra.gmra.mxu0 %v446_v17  ;;  %1049 = vmatprep.subr.mxu0 %v1355_v0 }
  0x89   : > { %1081 = vmatprep.mubr.msk.f32.mxu0 %vm1356_vm0, %v1355_v0  ;;  %1042 = vmatprep.subr.mxu1 %v1355_v0 }
  0x8a   : > { %1043 = vmatpush3.msra.mxu1 %v570_v40  ;;  %1050 = vmatpush3.msra.mxu0 %v711_v56 }
  0x8b   : > { %1044 = vmatprep.subr.mxu1 %v1355_v0  ;;  %1051 = vmatprep.subr.mxu0 %v1355_v0 }
  0x8c   : > { %1045 = vmatpush3.msra.mxu1 %v569_v41  ;;  %1052 = vmatpush3.msra.mxu0 %v710_v57 }
  0x8d   : > { %1053 = vmatprep.subr.mxu0 %v1355_v0 }
  0x8e   : > { %1054 = vmatpush3.msra.mxu0 %v709_v58 }
  0x8f   : > { %1055 = vmatprep.subr.mxu0 %v1355_v0 }
  0x90   : > { %1056 = vmatpush3.msra.mxu0 %v708_v3 }
  0x91   : > { %1057 = vmatprep.subr.mxu0 %v1355_v0 }
  0x92   : > { %1058 = vmatpush3.msra.mxu0 %v707_v4 }
  0x93   : > { %1059 = vmatprep.subr.mxu0 %v1355_v0 }
  0x94   : > { %1060 = vmatpush3.msra.mxu0 %v706_v5 }
  0x95   : > { %1061 = vmatprep.subr.mxu0 %v1355_v0 }
  0x96   : > { %1062 = vmatpush3.msra.mxu0 %v705_v6 }
  0x97   : > { %1063 = vmatprep.subr.mxu0 %v1355_v0 }
  0x98   : > { %1064 = vmatpush3.msra.mxu0 %v704_v7 }
  0x99   : > { %1065 = vmatprep.subr.mxu0 %v1355_v0 }
  0x9a   : > { %1066 = vmatpush3.msra.mxu0 %v703_v8 }
  0x9b   : > { %1067 = vmatprep.subr.mxu0 %v1355_v0 }
  0x9c   : > { %1068 = vmatpush3.msra.mxu0 %v702_v9 }
  0x9d   : > { %1069 = vmatprep.subr.mxu0 %v1355_v0 }
  0x9e   : > { %1070 = vmatpush3.msra.mxu0 %v701_v10 }
  0x9f   : > { %1071 = vmatprep.subr.mxu0 %v1355_v0 }
  0xa0   : > { %1072 = vmatpush3.msra.mxu0 %v700_v11 }
  0xa1   : > { %1073 = vmatprep.subr.mxu0 %v1355_v0 }
  0xa2   : > { %1074 = vmatpush3.msra.mxu0 %v699_v12 }
  0xa3   : > { %1075 = vmatprep.subr.mxu0 %v1355_v0 }
  0xa4   : > { %1076 = vmatpush3.msra.mxu0 %v698_v13 }
  0xa5   : > { %1077 = vmatprep.subr.mxu0 %v1355_v0 }
  0xa6   : > { %1078 = vmatpush3.msra.mxu0 %v697_v14 }
  0xa7   : > { %1079 = vmatprep.subr.mxu0 %v1355_v0 }
  0xa8   : > { %1080 = vmatpush3.msra.mxu0 %v696_v15 }
 0x148   : > { %v536_v19 = vpop.f32.mrf.mxu0 }
 0x149   : > { %v537_v20 = vadd.f32 %v917_v18, %v536_v19 }
 0x14a   : > { %v1013_v21 = vpop.f32.mrf.mxu0 }
 0x14b   : > { %540 = vadd.xlane.f32.xlu0 %v537_v20 }
 0x1d4   : > { %v541_v25 = vpop.xlane.xlu0 %540 }
 0x1d5   : > { %v543_v26 = vmul.f32 0.0078125, %v541_v25  ;;  %v923_v25 = vld [vmem:[%s1693_s10] ss:$0 sm:$0xff] }
 0x1d7   : > { %v544_v27 = vsub.f32 %v537_v20, %v543_v26  ;;  %v921_v20 = vld [vmem:[%s1690_s7] ss:$0 sm:$0xff] }
 0x1d9   : > { %v545_v28 = vmul.f32 %v544_v27, %v544_v27 }
 0x1db   : > { %546 = vadd.xlane.f32.xlu0 %v545_v28 }
 0x264   : > { %v547_v42 = vpop.xlane.xlu0 %546 }
 0x265   : > { %v548_v43 = vmul.f32 0.0078125, %v547_v42 }
 0x267   : > { %v549_v44 = vadd.f32 1e-05, %v548_v43 }
 0x269   : > { %1165 = vrsqrt.f32 %v549_v44 }
 0x276   : > { %v1166_v45 = vpop.eup %1165 }
 0x277   : > { %v551_v47 = vmul.f32 %v1166_v45, %v544_v27 }
 0x279   : > { %v559_v49 = vmul.f32 %v918_v46, %v551_v47 }
 0x27b   : > { %v567_v50 = vadd.f32 %v919_v48, %v559_v49 }
 0x27d   : > { %v568_v51 = vmax.f32 %v567_v50, 0.0 }
 0x27f   : > { %1047 = vmatmul.mubr.f32.vlgmr.msra.gmra.mxu1 %v568_v51 }
 0x33f   : > { %v658_v53 = vpop.f32.mrf.mxu1 }
 0x340   : > { %v659_v54 = vadd.f32 %v920_v52, %v658_v53 }
 0x341   : > { %v1048_v55 = vpop.f32.mrf.mxu1 }
 0x342   : > { %665 = vadd.xlane.f32.xlu1 %v659_v54 }
 0x3cb   : > { %v666_v61 = vpop.xlane.xlu1 %665 }
 0x3cc   : > { %v667_v62 = vmul.f32 0.015625, %v666_v61 }
 0x3ce   : > { %v668_v63 = vsub.f32 %v659_v54, %v667_v62 }
 0x3d0   : > { %v671_v1 = vsel %vm664_vm1, %v668_v63, 0.0 }
 0x3d1   : > { %v672_v2 = vmul.f32 %v671_v1, %v671_v1 }
 0x3d3   : > { %673 = vadd.xlane.f32.xlu1 %v672_v2 }
 0x45c   : > { %v674_v16 = vpop.xlane.xlu1 %673 }
 0x45d   : > { %v675_v17 = vmul.f32 0.015625, %v674_v16 }
 0x45f   : > { %v676_v18 = vadd.f32 1e-05, %v675_v17 }
 0x461   : > { %1167 = vrsqrt.f32 %v676_v18 }
 0x46e   : > { %v1168_v19 = vpop.eup %1167 }
 0x46f   : > { %v678_v21 = vmul.f32 %v1168_v19, %v671_v1 }
 0x471   : > { %v686_v23 = vmul.f32 %v921_v20, %v678_v21 }
 0x473   : > { %v694_v24 = vadd.f32 %v922_v22, %v686_v23 }
 0x475   : > { %v695_v0 = vmax.f32 %v694_v24, 0.0 }
 0x477   : > { %1082 = vmatmul.mubr.f32.vlgmr.msra.gmra.mxu0 %v695_v0 }
 0x537   : > { %v785_v26 = vpop.f32.mrf.mxu0 }
 0x538   : > { %v786_v27 = vadd.f32 %v923_v25, %v785_v26 }
 0x539   : > { %v1083_v28 = vpop.f32.mrf.mxu0 }
 0x53a   : > { %789 = vst [vmem:[%s445_s5] sm:$0xff] %v786_v27 }
 0x53b   : > { %1288 = shalt.err (!%p1285_p9)
}
 0x53c   : > { %s1289_s13 = scalar_lea.hbm %s1646_s28, 128  ;;  %s1293_s27 = scalar_lea.hbm %s1694_s11, 256 }
 0x53d   : > { %p1290_p13 = scmp.ne.s32.totalorder %s1646_s28, %s1289_s13  ;;  %p1294_p11 = scmp.lt.s32.totalorder %s1646_s28, %s1694_s11 }
 0x53e   : > { %p1295_p1 = scmp.lt.s32.totalorder %s1293_s27, %s1289_s13 }
 0x53f   : > { %p1291_p8 = pnand %p1290_p13, %p1724_p6 }
 0x540   : > { %p1296_p2 = por %p1295_p1, %p1294_p11 }
 0x541   : > { %p1292_p10 = pneg %p1291_p8 }
 0x543   : > { %p1297_p4 = pnand %p1296_p2, %p1292_p10 }
 0x545   : > { %1300 = shalt.err (!%p1297_p4)
}
 0x546   : > { %1098 = dma.vmem_to_hbm [thread:$0]  (%p1724_p6), %s805_s23, 128, %s1646_s28, %s791_s22  }
 0x547 PF: > { %s816_s1 = sand.u32 1, %s1335_s17   ;;  %p1725_p12 = scmp.ne.s32.totalorder %s1707_s24, 0 }
 0x548   : > { %p1726_p0 = scmp.ge.s32.totalorder %s1347_s20, 2  ;;  %s817_s5 = scalar_lea.sflag [#allocation4], %s816_s1 }
 0x54a   : > { %p1115_p5 = pnand %p1726_p0, %p1725_p12 }
 0x54c   : > { %p1116_p3 = pneg %p1115_p5 }
 0x54e   : > { %1330 = dma.done.wait (%p1116_p3), %s817_s5, 128  }
 0x54f   : > { %1332 = vsyncadd (%p1116_p3), %s817_s5, 4294967168  ;;  %s1727_s20 = sld [smem:[#allocation16_spill]]  ;;  %s1730_s17 = smov %s1339_s18 }
 0x550   : > { %s1728_s25 = sld [smem:[#allocation15_spill]] }
 0x551   : > { %s1729_s19 = sld [smem:[#allocation17_spill]] }
 0x555   : > { %p26_p7 = scmp.ge.s32.totalorder %s1727_s20, 4  }
 0x556   : > { %s1731_s18 = smov %s1728_s25 }
 0x557   :  { %28 = sbr.rel (!%p26_p7) target bundleno = 11 (0xb), region = 121 }
 0x55c   :  { %822 = vsyncpa [#allocation3], 1 }
 0x55d   :  { %824 = vsyncpa [#allocation3 + $0x1], 1 }
 0x55e   :  { %825 = vsyncpa [#allocation6], 1 }
 0x55f   :  { %826 = vsyncpa [#allocation9], 1 }
 0x560   :  { %827 = vsyncpa [#allocation4], 1 }
 0x561   :  { %829 = vsyncpa [#allocation4 + $0x1], 1 }

</bundles_post_ra>
